<compile_context>
chip_gen: v7x
topology: tpu7x:2x2x1
jax: 0.10.0
libtpu: 0.0.40
codegen_flags: <defaults>
</compile_context>

<pallas_src>
import math

import jax
import jax.numpy as jnp
from jax import lax
from jax.experimental import pallas as pl
from jax.experimental.pallas import tpu as pltpu

P_LOGVAR = -3.0                      # p_logvar_init (prior N(0, exp(-3)))
_HALF_LOG_2PI = 0.5 * math.log(2.0 * math.pi)
_HALF_EXP_NEG_PLOGVAR = 0.5 * math.exp(-P_LOGVAR)


def _round_up(v, m):
    return ((v + m - 1) // m) * m


# ---------------------------------------------------------------------------
# Kernel 1: local-reparameterization linear layer (tiled matmul, P1+P3+P9)
#   mean += x_tile @ w_tile.T ; var += (x_tile^2) @ (w_tile^2).T   (per K step)
#   out   = mean + sqrt(1e-8 + exp(log_alpha) * var) * eps         (finalize)
# ---------------------------------------------------------------------------
def _linear_noise_kernel(la_ref, x_ref, w_ref, eps_ref, out_ref,
                         mean_acc, var_acc):
    k = pl.program_id(2)

    @pl.when(k == 0)
    def _init():
        mean_acc[...] = jnp.zeros_like(mean_acc)
        var_acc[...] = jnp.zeros_like(var_acc)

    x = x_ref[...]
    w = w_ref[...]                      # (tn, tk) — squared in-kernel, no w2 input
    dn = (((1,), (1,)), ((), ()))       # contract K of both: (tm,tk)x(tn,tk)->(tm,tn)
    mean_acc[...] += lax.dot_general(x, w, dn,
                                     preferred_element_type=jnp.float32)
    var_acc[...] += lax.dot_general(x * x, w * w, dn,
                                    preferred_element_type=jnp.float32)

    @pl.when(k == pl.num_programs(2) - 1)
    def _finalize():
        var = jnp.exp(la_ref[0, 0]) * var_acc[...]   # scale once, not per K step
        out_ref[...] = (mean_acc[...]
                        + jnp.sqrt(1e-8 + var) * eps_ref[...]).astype(out_ref.dtype)


# ---------------------------------------------------------------------------
# Kernel 2: weight sample + KL( q(w) || p(w) ), tiled reduction over rows.
# Simplified integrand (w = mu + std*eps):
#   q - p = 0.5*P_LOGVAR - log(std) - 0.5*eps^2 + 0.5*exp(-P_LOGVAR)*w^2
# ---------------------------------------------------------------------------
def _kl_kernel(mu_ref, std_ref, eps_ref, kl_ref, acc_ref):
    i = pl.program_id(0)

    @pl.when(i == 0)
    def _init():
        acc_ref[0, 0] = jnp.float32(0.0)

    std = std_ref[...]
    eps = eps_ref[...]
    w = mu_ref[...] + std * eps
    acc_ref[0, 0] += jnp.sum(
        0.5 * P_LOGVAR
        - jnp.log(std)
        - 0.5 * (eps * eps)
        + _HALF_EXP_NEG_PLOGVAR * (w * w))

    @pl.when(i == pl.num_programs(0) - 1)
    def _finalize():
        kl_ref[0, 0] = acc_ref[0, 0]


# ---------------------------------------------------------------------------
# Wrapper: tile selection + zero-padding (mathematically neutral) + two calls.
# ---------------------------------------------------------------------------
def bbb_linear_factorial_forward(x, qw_mean, log_alpha, fc_qw_mean, fc_qw_std,
                                 eps_out, eps_w, *,
                                 compute_dtype=jnp.float32,   # bf16 for v6e/v7x MXU
                                 tm=256, tn=512, tk=512, kl_rows=512):
    B, K = x.shape
    N, K2 = qw_mean.shape
    assert K2 == K

    # --- tile selection: every block (8,128)-legal, output lanes padded to 128.
    tm = min(tm, _round_up(B, 8))
    tn = min(tn, _round_up(N, 128))          # lane-dense output stores
    tk = K if K <= tk else tk
    B_p = _round_up(B, tm)
    N_p = _round_up(N, tn)
    K_p = _round_up(K, tk)

    # Zero padding is exact: padded K columns contribute 0 to mean/var, padded
    # B rows / N columns are sliced off below.
    x_p = x if (B_p, K_p) == (B, K) else jnp.pad(x, ((0, B_p - B), (0, K_p - K)))
    w_p = qw_mean if (N_p, K_p) == (N, K) else jnp.pad(
        qw_mean, ((0, N_p - N), (0, K_p - K)))
    eps_p = eps_out if (B_p, N_p) == (B, N) else jnp.pad(
        eps_out, ((0, B_p - B), (0, N_p - N)))

    x_p = x_p.astype(compute_dtype)
    w_p = w_p.astype(compute_dtype)
    la = jnp.asarray(log_alpha, jnp.float32).reshape(1, 1)

    grid = (B_p // tm, N_p // tn, K_p // tk)
    out_p = pl.pallas_call(
        _linear_noise_kernel,
        grid=grid,
        in_specs=[
            pl.BlockSpec(memory_space=pltpu.SMEM),             # log_alpha (1,1)
            pl.BlockSpec((tm, tk), lambda i, j, k: (i, k)),    # x
            pl.BlockSpec((tn, tk), lambda i, j, k: (j, k)),    # qw_mean (N,K), no host .T
            pl.BlockSpec((tm, tn), lambda i, j, k: (i, j)),    # eps_out
        ],
        out_specs=pl.BlockSpec((tm, tn), lambda i, j, k: (i, j)),
        out_shape=jax.ShapeDtypeStruct((B_p, N_p), jnp.float32),
        scratch_shapes=[pltpu.VMEM((tm, tn), jnp.float32),     # mean accumulator
                        pltpu.VMEM((tm, tn), jnp.float32)],    # var accumulator
        compiler_params=pltpu.CompilerParams(
            dimension_semantics=("parallel", "parallel", "arbitrary")),
    )(la, x_p, w_p, eps_p)
    output = out_p[:B, :N]

    # --- KL reduction, tiled over weight rows (full K per tile, K is lane axis).
    t_rows = N
    if N > kl_rows:
        t_rows = kl_rows if N % kl_rows == 0 else next(
            (t for t in range(kl_rows, 7, -8) if N % t == 0), N)
    kl = pl.pallas_call(
        _kl_kernel,
        grid=(N // t_rows,),
        in_specs=[pl.BlockSpec((t_rows, K), lambda i: (i, 0))] * 3,
        out_specs=pl.BlockSpec(memory_space=pltpu.SMEM),
        out_shape=jax.ShapeDtypeStruct((1, 1), jnp.float32),
        scratch_shapes=[pltpu.SMEM((1, 1), jnp.float32)],
        compiler_params=pltpu.CompilerParams(
            dimension_semantics=("arbitrary",)),
    )(fc_qw_mean, fc_qw_std, eps_w)[0, 0]

    # TODO(synk): eps_out / eps_w could be generated on-chip with
    # pltpu.prng_seed + pltpu.prng_random_bits to drop a weight-sized HBM read,
    # but that changes the RNG stream vs. the torch reference, so it is kept
    # as an explicit input here.
    return output, kl


# ---------------------------------------------------------------------------
# Pure-JAX reference (full, unsimplified formulas — correctness oracle)
# ---------------------------------------------------------------------------
def _reference(x, qw_mean, log_alpha, fc_qw_mean, fc_qw_std, eps_out, eps_w):
    mean = x @ qw_mean.T
    si = jnp.sqrt(1e-8 + (x * x) @ (jnp.exp(log_alpha) * qw_mean * qw_mean).T)
    out = mean + si * eps_out
    w = fc_qw_mean + fc_qw_std * eps_w
    q = (-_HALF_LOG_2PI - jnp.log(fc_qw_std)
         - (w - fc_qw_mean) ** 2 / (2.0 * fc_qw_std ** 2))
    p = -_HALF_LOG_2PI - 0.5 * P_LOGVAR - w * w / (2.0 * math.exp(P_LOGVAR))
    return out, jnp.sum(q - p)


if __name__ == "__main__":
    B, in_features, out_features = 8, 32, 16
    stdv = 10.0 / math.sqrt(in_features)

    key = jax.random.PRNGKey(0)
    keys = jax.random.split(key, 8)

    # Deterministic parameter init (shapes per the module's __init__).
    qw_mean = jax.random.uniform(keys[0], (out_features, in_features),
                                 jnp.float32, -stdv, stdv)
    fc_qw_mean = jax.random.uniform(keys[1], (out_features, in_features),
                                    jnp.float32, -stdv, stdv)
    # fc_qw_std made strictly positive so log(std) in the logpdf is finite
    # (the torch uniform init can yield negative std -> NaN KL).
    fc_qw_std = jnp.abs(jax.random.uniform(keys[2], (out_features, in_features),
                                           jnp.float32, -stdv, stdv)) + 0.1
    log_alpha = jax.random.uniform(keys[3], (1, 1), jnp.float32, -stdv, stdv)

    # Inputs and the gaussian noise draws (torch.randn / Normal.sample()).
    x = jax.random.normal(keys[4], (B, in_features), jnp.float32)
    eps_out = jax.random.normal(keys[5], (B, out_features), jnp.float32)
    eps_w = jax.random.normal(keys[6], (out_features, in_features), jnp.float32)

    out, kl = bbb_linear_factorial_forward(
        x, qw_mean, log_alpha, fc_qw_mean, fc_qw_std, eps_out, eps_w)
    out = jax.block_until_ready(out)
    kl = jax.block_until_ready(kl)

    out_ref, kl_ref = _reference(
        x, qw_mean, log_alpha, fc_qw_mean, fc_qw_std, eps_out, eps_w)

    assert out.shape == (B, out_features)
    assert jnp.allclose(out, out_ref, rtol=1e-4, atol=1e-3), \
        float(jnp.max(jnp.abs(out - out_ref)))
    assert jnp.allclose(kl, kl_ref, rtol=1e-4, atol=1e-3), \
        (float(kl), float(kl_ref))

    # bf16 MXU inputs / f32 accumulation (v6e / v7x fast path), loose tolerance.
    out_bf16, kl2 = bbb_linear_factorial_forward(
        x, qw_mean, log_alpha, fc_qw_mean, fc_qw_std, eps_out, eps_w,
        compute_dtype=jnp.bfloat16)
    out_bf16 = jax.block_until_ready(out_bf16)
    kl2 = jax.block_until_ready(kl2)
    assert jnp.allclose(out_bf16, out_ref, rtol=1e-1, atol=1.0)
    assert jnp.allclose(kl2, kl_ref, rtol=1e-4, atol=1e-3)

    print("KERNEL_OK")
</pallas_src>

<mosaic_0001>
module attributes {stable_mosaic.version = 11 : i64} {
  func.func @_linear_noise_kernel(%arg0: i32, %arg1: i32, %arg2: i32, %arg3: memref<1x1xf32, #tpu.memory_space<smem>>, %arg4: memref<8x32xf32, #tpu.memory_space<vmem>>, %arg5: memref<128x32xf32, #tpu.memory_space<vmem>>, %arg6: memref<8x128xf32, #tpu.memory_space<vmem>>, %arg7: memref<8x128xf32, #tpu.memory_space<vmem>>, %arg8: memref<8x128xf32, #tpu.memory_space<vmem>>, %arg9: memref<8x128xf32, #tpu.memory_space<vmem>>) attributes {dimension_semantics = [#tpu.dimension_semantics<parallel>, #tpu.dimension_semantics<parallel>, #tpu.dimension_semantics<arbitrary>], iteration_bounds = array<i64: 1, 1, 1>, scalar_prefetch = 0 : i64, scratch_operands = 2 : i64, tpu.core_type = #tpu.core_type<tc>, window_params = [{transform_indices = @transform_0, window_bounds = array<i64: 1, 1>}, {transform_indices = @transform_1, window_bounds = array<i64: 8, 32>}, {transform_indices = @transform_2, window_bounds = array<i64: 128, 32>}, {transform_indices = @transform_3, window_bounds = array<i64: 8, 128>}, {transform_indices = @transform_4, window_bounds = array<i64: 8, 128>}]} {
    %c0_i32 = arith.constant 0 : i32
    %0 = arith.cmpi eq, %arg2, %c0_i32 : i32
    %1 = arith.extui %0 : i1 to i32
    %c0_i32_0 = arith.constant 0 : i32
    %2 = arith.cmpi ne, %1, %c0_i32_0 : i32
    scf.if %2 {
      %cst_15 = arith.constant 0.000000e+00 : f32
      %18 = vector.broadcast %cst_15 : f32 to vector<8x128xf32>
      %c0_16 = arith.constant 0 : index
      %c0_17 = arith.constant 0 : index
      %19 = vector.load %arg8[%c0_16, %c0_17] : memref<8x128xf32, #tpu.memory_space<vmem>>, vector<8x128xf32>
      tpu.vector_store %arg8[%c0_16, %c0_17], %18 {strides = array<i32>} : memref<8x128xf32, #tpu.memory_space<vmem>>, vector<8x128xf32>,
      %cst_18 = arith.constant 0.000000e+00 : f32
      %20 = vector.broadcast %cst_18 : f32 to vector<8x128xf32>
      %c0_19 = arith.constant 0 : index
      %c0_20 = arith.constant 0 : index
      %21 = vector.load %arg9[%c0_19, %c0_20] : memref<8x128xf32, #tpu.memory_space<vmem>>, vector<8x128xf32>
      tpu.vector_store %arg9[%c0_19, %c0_20], %20 {strides = array<i32>} : memref<8x128xf32, #tpu.memory_space<vmem>>, vector<8x128xf32>,
    } else {
    }
    %c0 = arith.constant 0 : index
    %c0_1 = arith.constant 0 : index
    %3 = vector.load %arg4[%c0, %c0_1] : memref<8x32xf32, #tpu.memory_space<vmem>>, vector<8x32xf32>
    %c0_2 = arith.constant 0 : index
    %c0_3 = arith.constant 0 : index
    %4 = vector.load %arg5[%c0_2, %c0_3] : memref<128x32xf32, #tpu.memory_space<vmem>>, vector<128x32xf32>
    %c0_4 = arith.constant 0 : index
    %c0_5 = arith.constant 0 : index
    %5 = vector.load %arg8[%c0_4, %c0_5] : memref<8x128xf32, #tpu.memory_space<vmem>>, vector<8x128xf32>
    %cst = arith.constant dense<0.000000e+00> : vector<8x128xf32>
    %6 = tpu.matmul %3, %4, %cst {dimension_numbers = #tpu.dot_dimension_numbers<[1], [1], [0], [0], [0, 0, 1, 0], [], []>} : vector<8x32xf32>, vector<128x32xf32>, vector<8x128xf32> -> vector<8x128xf32>
    %7 = arith.addf %5, %6 : vector<8x128xf32>
    %c0_6 = arith.constant 0 : index
    %c0_7 = arith.constant 0 : index
    %8 = vector.load %arg8[%c0_6, %c0_7] : memref<8x128xf32, #tpu.memory_space<vmem>>, vector<8x128xf32>
    tpu.vector_store %arg8[%c0_6, %c0_7], %7 {strides = array<i32>} : memref<8x128xf32, #tpu.memory_space<vmem>>, vector<8x128xf32>,
    %c0_8 = arith.constant 0 : index
    %c0_9 = arith.constant 0 : index
    %9 = vector.load %arg9[%c0_8, %c0_9] : memref<8x128xf32, #tpu.memory_space<vmem>>, vector<8x128xf32>
    %10 = arith.mulf %3, %3 : vector<8x32xf32>
    %11 = arith.mulf %4, %4 : vector<128x32xf32>
    %cst_10 = arith.constant dense<0.000000e+00> : vector<8x128xf32>
    %12 = tpu.matmul %10, %11, %cst_10 {dimension_numbers = #tpu.dot_dimension_numbers<[1], [1], [0], [0], [0, 0, 1, 0], [], []>} : vector<8x32xf32>, vector<128x32xf32>, vector<8x128xf32> -> vector<8x128xf32>
    %13 = arith.addf %9, %12 : vector<8x128xf32>
    %c0_11 = arith.constant 0 : index
    %c0_12 = arith.constant 0 : index
    %14 = vector.load %arg9[%c0_11, %c0_12] : memref<8x128xf32, #tpu.memory_space<vmem>>, vector<8x128xf32>
    tpu.vector_store %arg9[%c0_11, %c0_12], %13 {strides = array<i32>} : memref<8x128xf32, #tpu.memory_space<vmem>>, vector<8x128xf32>,
    %c0_i32_13 = arith.constant 0 : i32
    %15 = arith.cmpi eq, %arg2, %c0_i32_13 : i32
    %16 = arith.extui %15 : i1 to i32
    %c0_i32_14 = arith.constant 0 : i32
    %17 = arith.cmpi ne, %16, %c0_i32_14 : i32
    scf.if %17 {
      %c0_15 = arith.constant 0 : index
      %c0_16 = arith.constant 0 : index
      %18 = memref.load %arg3[%c0_15, %c0_16] : memref<1x1xf32, #tpu.memory_space<smem>>
      %19 = math.exp %18 : f32
      %c0_17 = arith.constant 0 : index
      %c0_18 = arith.constant 0 : index
      %20 = vector.load %arg9[%c0_17, %c0_18] : memref<8x128xf32, #tpu.memory_space<vmem>>, vector<8x128xf32>
      %21 = vector.broadcast %19 : f32 to vector<8x128xf32>
      %22 = arith.mulf %21, %20 : vector<8x128xf32>
      %c0_19 = arith.constant 0 : index
      %c0_20 = arith.constant 0 : index
      %23 = vector.load %arg8[%c0_19, %c0_20] : memref<8x128xf32, #tpu.memory_space<vmem>>, vector<8x128xf32>
      %cst_21 = arith.constant 9.99999993E-9 : f32
      %24 = vector.broadcast %cst_21 : f32 to vector<8x128xf32>
      %25 = arith.addf %24, %22 : vector<8x128xf32>
      %26 = math.sqrt %25 : vector<8x128xf32>
      %c0_22 = arith.constant 0 : index
      %c0_23 = arith.constant 0 : index
      %27 = vector.load %arg6[%c0_22, %c0_23] : memref<8x128xf32, #tpu.memory_space<vmem>>, vector<8x128xf32>
      %28 = arith.mulf %26, %27 : vector<8x128xf32>
      %29 = arith.addf %23, %28 : vector<8x128xf32>
      %c0_24 = arith.constant 0 : index
      %c0_25 = arith.constant 0 : index
      %30 = vector.load %arg7[%c0_24, %c0_25] : memref<8x128xf32, #tpu.memory_space<vmem>>, vector<8x128xf32>
      tpu.vector_store %arg7[%c0_24, %c0_25], %29 {strides = array<i32>} : memref<8x128xf32, #tpu.memory_space<vmem>>, vector<8x128xf32>,
    } else {
    }
    return
  }
  func.func @transform_0(%arg0: i32, %arg1: i32, %arg2: i32) -> (i32, i32) {
    %c0_i32 = arith.constant 0 : i32
    %c0_i32_0 = arith.constant 0 : i32
    %c0_i32_1 = arith.constant 0 : i32
    return %c0_i32, %c0_i32_0 : i32, i32
  }
  func.func @transform_1(%arg0: i32, %arg1: i32, %arg2: i32) -> (i32, i32) {
    %c0_i32 = arith.constant 0 : i32
    return %arg0, %arg2 : i32, i32
  }
  func.func @transform_2(%arg0: i32, %arg1: i32, %arg2: i32) -> (i32, i32) {
    %c0_i32 = arith.constant 0 : i32
    return %arg1, %arg2 : i32, i32
  }
  func.func @transform_3(%arg0: i32, %arg1: i32, %arg2: i32) -> (i32, i32) {
    %c0_i32 = arith.constant 0 : i32
    return %arg0, %arg1 : i32, i32
  }
  func.func @transform_4(%arg0: i32, %arg1: i32, %arg2: i32) -> (i32, i32) {
    %c0_i32 = arith.constant 0 : i32
    return %arg0, %arg1 : i32, i32
  }
}

</mosaic_0001>

<bundles_post_ra>
// kernel: tpu_custom_call.1
= control target key start
LH: loop header
LB: loop body
LE: loop exit
PB: predicated region body
PF: predicated region fallthrough
CT: control target
= control target key end

     0   :  { %vm43_vm0 = vcmask 261120   ;;  %v582_v2 = vmov 0.0|0.0   ;;  %vm583_vm2 = vmmov 0   ;;  %v584_v9 = vmov 0.0   ;;  %s736_s0 = inlined_call_operand.<no memory space> [shape: f32[1,1], index: 0, kind: input, shape index: {}]   ;;  %s737_s1 = inlined_call_operand.vmem [shape: f32[8,32], index: 1, kind: input, shape index: {}]   ;;  %s738_s2 = inlined_call_operand.vmem [shape: f32[128,32], index: 2, kind: input, shape index: {}]   ;;  %s739_s3 = inlined_call_operand.vmem [shape: f32[8,128], index: 3, kind: input, shape index: {}]   ;;  %s740_s4 = inlined_call_operand.hbm [shape: f32[8,128], index: 4, kind: output, shape index: {}]  }
   0x1   :  { %v26_v0 = vld [vmem:[%s738_s2] sm:$0xff]  ;;  %v27_v1 = vld [vmem:[%s738_s2 + $0x8] sm:$0xff]  ;;  %516 = vmatprep.subr.bf16.mxu1 %v582_v2  ;;  %484 = vmatprep.subr.bf16.mxu0 %v582_v2  ;;  %vm621_vm1 = vmpackc.low %vm43_vm0, %vm43_vm0  ;;  %v312_v10 = vstv %s736_s0 }
   0x2   :  { %v169_v3 = vmul.f32 %v26_v0, %v26_v0  ;;  %v170_v4 = vmul.f32 %v27_v1, %v27_v1  ;;  %v28_v6 = vld [vmem:[%s738_s2 + $0x10] sm:$0xff]  ;;  %v29_v7 = vld [vmem:[%s738_s2 + $0x18] sm:$0xff]  ;;  %v485_v8 = vpack.c.bf16 %v27_v1, %v26_v0  ;;  %481 = vmatprep.mubr.msk.f32.mxu1 %vm583_vm2, %v584_v9  ;;  %446 = vmatprep.mubr.msk.f32.mxu0 %vm583_vm2, %v584_v9  ;;  %v313_v14 = vmul.f32 1.442695, %v312_v10 }
   0x3   :  { %v171_v12 = vmul.f32 %v28_v6, %v28_v6  ;;  %v172_v13 = vmul.f32 %v29_v7, %v29_v7 }
   0x4   :  { %v517_v11 = vpack.c.bf16 %v170_v4, %v169_v3  ;;  %487 = vmatpush3.bf16.xpose.msk.msra.mxu0 %vm621_vm1, %v485_v8 }
   0x5   :  { %488 = vmatprep.subr.bf16.mxu0 %v582_v2 }
   0x6   :  { %519 = vmatpush3.bf16.xpose.msk.msra.mxu1 %vm621_vm1, %v517_v11 }
   0x7   :  { %520 = vmatprep.subr.bf16.mxu1 %v582_v2 }
   0x8   :  { %10 = vsyncpa [#allocation6], 0  ;;  %v489_v15 = vpack.c.bf16 %v29_v7, %v28_v6  ;;  %v521_v16 = vpack.c.bf16 %v172_v13, %v171_v12  ;;  %554 = vpow2.f32 %v313_v14  ;;  %v30_v17 = vld [vmem:[%s738_s2 + $0x20] sm:$0xff]  ;;  %v31_v18 = vld [vmem:[%s738_s2 + $0x28] sm:$0xff]  ;;  %s585_s0 = smov [#allocation5]  }
   0x9   :  { %v173_v19 = vmul.f32 %v30_v17, %v30_v17  ;;  %v174_v20 = vmul.f32 %v31_v18, %v31_v18  ;;  %v493_v21 = vpack.c.bf16 %v31_v18, %v30_v17  ;;  %v32_v23 = vld [vmem:[%s738_s2 + $0x30] sm:$0xff]  ;;  %v33_v24 = vld [vmem:[%s738_s2 + $0x38] sm:$0xff]  ;;  %v34_v30 = vld [vmem:[%s738_s2 + $0x40] sm:$0xff]  ;;  %s338_s25 = sshll.u32 %s585_s0, 4  ;;  %s339_s25 = int_to_ptr.vmem [resolvable:$true] %s338_s25 }
   0xa   :  { %v175_v26 = vmul.f32 %v32_v23, %v32_v23  ;;  %v176_v27 = vmul.f32 %v33_v24, %v33_v24  ;;  %v497_v28 = vpack.c.bf16 %v33_v24, %v32_v23  ;;  %v35_v31 = vld [vmem:[%s738_s2 + $0x48] sm:$0xff]  ;;  %v177_v32 = vmul.f32 %v34_v30, %v34_v30  ;;  %v36_v36 = vld [vmem:[%s738_s2 + $0x50] sm:$0xff]  ;;  %v37_v37 = vld [vmem:[%s738_s2 + $0x58] sm:$0xff]  ;;  %s558_s26 = scalar_lea.vmem %s339_s25, 128  ;;  %p563_p1 = scmp.lt.s32.totalorder %s339_s25, %s339_s25 }
   0xb   :  { %v525_v22 = vpack.c.bf16 %v174_v20, %v173_v19  ;;  %v178_v33 = vmul.f32 %v35_v31, %v35_v31  ;;  %v501_v34 = vpack.c.bf16 %v35_v31, %v34_v30  ;;  %v179_v38 = vmul.f32 %v36_v36, %v36_v36  ;;  %v38_v42 = vld [vmem:[%s738_s2 + $0x60] sm:$0xff]  ;;  %v39_v43 = vld [vmem:[%s738_s2 + $0x68] sm:$0xff]  ;;  %v40_v48 = vld [vmem:[%s738_s2 + $0x70] sm:$0xff]  ;;  %p559_p0 = scmp.ne.s32.totalorder %s339_s25, %s558_s26  ;;  %p564_p2 = scmp.lt.s32.totalorder %s558_s26, %s558_s26 }
   0xc   :  { %491 = vmatpush3.bf16.xpose.msk.msra.mxu0 %vm621_vm1, %v489_v15  ;;  %v529_v29 = vpack.c.bf16 %v176_v27, %v175_v26  ;;  %v180_v39 = vmul.f32 %v37_v37, %v37_v37  ;;  %v505_v40 = vpack.c.bf16 %v37_v37, %v36_v36  ;;  %v181_v44 = vmul.f32 %v38_v42, %v38_v42  ;;  %v41_v49 = vld [vmem:[%s738_s2 + $0x78] sm:$0xff]  ;;  %v25_v54 = vld [vmem:[%s737_s1] sm:$0xff] }
   0xd   :  { %492 = vmatprep.subr.bf16.mxu0 %v582_v2  ;;  %v533_v35 = vpack.c.bf16 %v178_v33, %v177_v32  ;;  %v182_v45 = vmul.f32 %v39_v43, %v39_v43  ;;  %v509_v46 = vpack.c.bf16 %v39_v43, %v38_v42  ;;  %v183_v50 = vmul.f32 %v40_v48, %v40_v48  ;;  %p565_p3 = por %p564_p2, %p563_p1 }
   0xe   :  { %523 = vmatpush3.bf16.xpose.msk.msra.mxu1 %vm621_vm1, %v521_v16  ;;  %v537_v41 = vpack.c.bf16 %v180_v39, %v179_v38  ;;  %v184_v51 = vmul.f32 %v41_v49, %v41_v49  ;;  %v513_v52 = vpack.c.bf16 %v41_v49, %v40_v48  ;;  %v168_v55 = vmul.f32 %v25_v54, %v25_v54 }
   0xf   :  { %524 = vmatprep.subr.bf16.mxu1 %v582_v2  ;;  %v541_v47 = vpack.c.bf16 %v182_v45, %v181_v44  ;;  %p566_p4 = pnand %p565_p3, %p559_p0 }
  0x10   :  { %v545_v53 = vpack.c.bf16 %v184_v51, %v183_v50 }
  0x12   :  { %v555_v25 = vpop.eup %554 }
  0x13   :  { %548 = vpush %v555_v25 }
  0x14   :  { %495 = vmatpush3.bf16.xpose.msk.msra.mxu0 %vm621_vm1, %v493_v21 }
  0x15   :  { %496 = vmatprep.subr.bf16.mxu0 %v582_v2 }
  0x16   :  { %527 = vmatpush3.bf16.xpose.msk.msra.mxu1 %vm621_vm1, %v525_v22 }
  0x17   :  { %528 = vmatprep.subr.bf16.mxu1 %v582_v2 }
  0x1c   :  { %499 = vmatpush3.bf16.xpose.msk.msra.mxu0 %vm621_vm1, %v497_v28 }
  0x1d   :  { %500 = vmatprep.subr.bf16.mxu0 %v582_v2 }
  0x1e   :  { %531 = vmatpush3.bf16.xpose.msk.msra.mxu1 %vm621_vm1, %v529_v29 }
  0x1f   :  { %532 = vmatprep.subr.bf16.mxu1 %v582_v2 }
  0x24   :  { %503 = vmatpush3.bf16.xpose.msk.msra.mxu0 %vm621_vm1, %v501_v34 }
  0x25   :  { %504 = vmatprep.subr.bf16.mxu0 %v582_v2 }
  0x26   :  { %535 = vmatpush3.bf16.xpose.msk.msra.mxu1 %vm621_vm1, %v533_v35 }
  0x27   :  { %536 = vmatprep.subr.bf16.mxu1 %v582_v2 }
  0x2c   :  { %507 = vmatpush3.bf16.xpose.msk.msra.mxu0 %vm621_vm1, %v505_v40 }
  0x2d   :  { %508 = vmatprep.subr.bf16.mxu0 %v582_v2 }
  0x2e   :  { %539 = vmatpush3.bf16.xpose.msk.msra.mxu1 %vm621_vm1, %v537_v41 }
  0x2f   :  { %540 = vmatprep.subr.bf16.mxu1 %v582_v2 }
  0x34   :  { %511 = vmatpush3.bf16.xpose.msk.msra.mxu0 %vm621_vm1, %v509_v46 }
  0x35   :  { %512 = vmatprep.subr.bf16.mxu0 %v582_v2 }
  0x36   :  { %543 = vmatpush3.bf16.xpose.msk.msra.mxu1 %vm621_vm1, %v541_v47 }
  0x37   :  { %544 = vmatprep.subr.bf16.mxu1 %v582_v2  ;;  %v328_v2 = vld [vmem:[%s739_s3] sm:$0xff] }
  0x3c   :  { %515 = vmatpush3.bf16.xpose.msk.msra.mxu0 %vm621_vm1, %v513_v52 }
  0x3e   :  { %547 = vmatpush3.bf16.xpose.msk.msra.mxu1 %vm621_vm1, %v545_v53 }
  0x43   :  { %447 = vmatmul.mubr.msk.f32.vlgmr.msra.gmra.mrb[0].mxu0 %vm43_vm0, %v25_v54 }
  0x44   :  { %s549_s23 = spop %548 }
  0x45   :  { %482 = vmatmul.mubr.msk.f32.vlgmr.msra.gmra.mrb[0].mxu1 %vm43_vm0, %v168_v55  ;;  %v317_v56 = vstv %s549_s23 }
 0x116   :  { %v161_v57 = vpop.f32.mrb[0].mxu0 }
 0x117   :  { %v448_v59 = vpop.f32.mrb[1].mxu0 }
 0x118   :  { %v302_v58 = vpop.f32.mrb[0].mxu1 }
 0x119   :  { %v318_v60 = vmul.f32 %v317_v56, %v302_v58  ;;  %v483_v61 = vpop.f32.mrb[1].mxu1 }
 0x11b   :  { %v320_v62 = vadd.f32 1e-08, %v318_v60 }
 0x11d   :  { %556 = vrsqrt.f32 %v320_v62  ;;  %vm323_vm3 = vcmp.eq.f32.partialorder %v320_v62, inf  ;;  %v326_v1 = vand.u32 2147483648, %v320_v62  ;;  %vm325_vm4 = vcmp.eq.f32.partialorder %v320_v62, 0.0 }
 0x127   :  { %v557_v63 = vpop.eup %556 }
 0x128   :  { %v322_v0 = vmul.f32 %v557_v63, %v320_v62 }
 0x12a   :  { %v324_v3 = vsel %vm323_vm3, %v320_v62, %v322_v0 }
 0x12b   :  { %v327_v4 = vsel %vm325_vm4, %v326_v1, %v324_v3 }
 0x12c   :  { %v329_v5 = vmul.f32 %v328_v2, %v327_v4 }
 0x12e   :  { %v330_v6 = vadd.f32 %v329_v5, %v161_v57 }
 0x130   :  { %331 = vst [vmem:[#allocation5] sm:$0xff] %v330_v6 }
 0x131   :  { %569 = shalt.err (!%p566_p4)
}
 0x132   :  { %s570_s3 = scalar_lea.hbm %s740_s4, 128 }
 0x133   :  { %p571_p5 = scmp.ne.s32.totalorder %s740_s4, %s570_s3  ;;  %p574_p6 = scmp.lt.u32.totalorder %s570_s3, %s740_s4 }
 0x135   :  { %p576_p7 = pnand %p574_p6, %p571_p5 }
 0x137   :  { %579 = shalt.err (!%p576_p7)
}
 0x138   :  { %341 = dma.vmem_to_hbm [thread:$0]  %s339_s25, 128, %s740_s4, [#allocation6]  }
 0x139   :  { %580 = dma.done.wait [#allocation6], 128  }
 0x13a   :  { %581 = vsyncadd [#allocation6], 4294967168 }
 0x13b   :  { %345 = vsyncpa [#allocation6], 1 }

</bundles_post_ra>
